<compile_context>
chip_gen: v5e
topology: v5e:2x2
jax: 0.10.0
libtpu: 0.0.40
codegen_flags: <defaults>
</compile_context>

<pallas_src>
import jax
import jax.numpy as jnp
from jax import lax
from jax.experimental import pallas as pl
from jax.experimental.pallas import tpu as pltpu


_LANE = 128
_SUBLANE = 8


def _round_up(x, m):
    return ((x + m - 1) // m) * m


def _sigmoid_f32(x):
    # Single EUP transcendental per element (vs exp + divide for the naive form).
    return 0.5 * jnp.tanh(0.5 * x) + 0.5


def _ipd_kernel_resident(a_ref, bt_ref, o_ref):
    # a_ref : (tm, D)          row tile of inp
    # bt_ref: (D, n_col_pad)   inp.T, fully resident in VMEM (constant index_map)
    # o_ref : (tm, tn)         output tile
    tn = o_ref.shape[1]
    j = pl.program_id(1)
    start = pl.multiple_of(j * tn, tn)
    b = bt_ref[:, pl.ds(start, tn)]                       # (D, tn), lane-dense slice
    acc = lax.dot_general(
        a_ref[...], b,
        dimension_numbers=(((1,), (0,)), ((), ())),       # (tm,D) x (D,tn) -> (tm,tn)
        preferred_element_type=jnp.float32)               # MXU, f32 accumulation
    o_ref[...] = _sigmoid_f32(acc).astype(o_ref.dtype)


def _ipd_kernel_streamed(a_ref, bt_ref, o_ref):
    # Fallback for very large N: bt_ref is a (D, tn) column tile streamed from HBM.
    acc = lax.dot_general(
        a_ref[...], bt_ref[...],
        dimension_numbers=(((1,), (0,)), ((), ())),
        preferred_element_type=jnp.float32)
    o_ref[...] = _sigmoid_f32(acc).astype(o_ref.dtype)


def _pick_tiles(n):
    """(tm, tn) output tile: tn lane-dense & wide; tm keeps >= 2 row blocks (v7x 2 TCs)."""
    n128 = _round_up(n, _LANE)
    tn = min(2048, n128)
    if n128 <= 256:
        tm = 128
    else:
        tm = max(128, min(512, (n128 // 2) // _LANE * _LANE))
    return tm, tn


def inner_product_decoder(inp, *, dropout=0.0, training=False, out_dtype=None):
    """sigmoid(inp @ inp.T) as a single Pallas TPU kernel.

    The kernel is HBM-output-write bound; out_dtype=jnp.bfloat16 halves the
    dominant traffic (~2x end-to-end) and is strongly recommended when the
    consumer tolerates bf16. Default keeps the input dtype (PyTorch semantics).
    """
    if training and dropout > 0.0:
        # TODO(synk): training-mode dropout (p > 0) not implemented; module default p=0.0.
        raise NotImplementedError("dropout > 0 in training mode is not implemented")

    inp = jnp.asarray(inp)
    N, D = inp.shape
    out_dtype = jnp.dtype(out_dtype) if out_dtype is not None else jnp.dtype(inp.dtype)
    in_itemsize = jnp.dtype(inp.dtype).itemsize
    out_itemsize = out_dtype.itemsize

    tm, tn = _pick_tiles(N)
    grid = (pl.cdiv(N, tm), pl.cdiv(N, tn))
    n_row_pad = grid[0] * tm     # A rows padded (cheap: N*D elements), blocks divide evenly
    n_col_pad = grid[1] * tn     # inp.T cols padded so in-kernel pl.ds stays in bounds

    a_op = inp if n_row_pad == N else jnp.pad(inp, ((0, n_row_pad - N), (0, 0)))
    bt_op = inp.T                # (D, N): lane-dense layout for the RHS of the matmul
    if n_col_pad != N:
        bt_op = jnp.pad(bt_op, ((0, 0), (0, n_col_pad - N)))

    # Keep inp.T resident in VMEM unless it is genuinely huge.
    resident_bytes = _round_up(D, _SUBLANE) * n_col_pad * in_itemsize
    use_resident = resident_bytes <= (16 << 20)

    if use_resident:
        kernel = _ipd_kernel_resident
        b_spec = pl.BlockSpec((D, n_col_pad), lambda i, j: (0, 0))   # whole array, resident
        b_block_bytes = resident_bytes
        b_read_bytes = D * n_col_pad * in_itemsize
    else:
        kernel = _ipd_kernel_streamed
        b_spec = pl.BlockSpec((D, tn), lambda i, j: (0, j))          # streamed column tiles
        b_block_bytes = _round_up(D, _SUBLANE) * tn * in_itemsize
        b_read_bytes = grid[0] * D * n_col_pad * in_itemsize         # re-read per row block

    # VMEM budget (double-buffered pipeline buffers, lane-padded block shapes).
    a_block_bytes = tm * _round_up(D, _LANE) * in_itemsize
    out_block_bytes = tm * tn * out_itemsize
    vmem_need = 2 * (a_block_bytes + out_block_bytes + b_block_bytes)
    # Stay well under v7x's 64 MiB physical VMEM (v5e/v6e have 128 MiB).
    vmem_limit = int(min(max(vmem_need + (8 << 20), 32 << 20), 48 << 20))

    cost = pl.CostEstimate(
        flops=2 * n_row_pad * n_col_pad * D,
        transcendentals=n_row_pad * n_col_pad,
        bytes_accessed=(n_row_pad * D * in_itemsize      # A read
                        + b_read_bytes                   # inp.T read(s)
                        + N * N * out_itemsize),         # output write (dominant)
    )

    out = pl.pallas_call(
        kernel,
        out_shape=jax.ShapeDtypeStruct((N, N), out_dtype),
        grid_spec=pltpu.PrefetchScalarGridSpec(
            num_scalar_prefetch=0,
            grid=grid,
            in_specs=[
                pl.BlockSpec((tm, D), lambda i, j: (i, 0)),   # row block of inp
                b_spec,                                        # inp.T (columns)
            ],
            out_specs=pl.BlockSpec((tm, tn), lambda i, j: (i, j)),
        ),
        compiler_params=pltpu.CompilerParams(
            dimension_semantics=("parallel", "parallel"),
            vmem_limit_bytes=vmem_limit,
        ),
        cost_estimate=cost,
    )(a_op, bt_op)
    return out


if __name__ == "__main__":
    key = jax.random.PRNGKey(0)
    k1, k2 = jax.random.split(key)

    # Case 1: tile-aligned (num_nodes=256, latent dim=32) -> grid (2, 1),
    # resident inp.T, both v7x TensorCores busy.
    n1, d1 = 256, 32
    x1 = jax.random.normal(k1, (n1, d1), dtype=jnp.float32)
    out1 = jax.block_until_ready(inner_product_decoder(x1))
    ref1 = jax.nn.sigmoid(x1 @ x1.T)
    assert out1.shape == (n1, n1) and out1.dtype == x1.dtype
    assert jnp.allclose(out1, ref1, atol=1e-4, rtol=1e-4)

    # Case 2: non-aligned shape exercises the cdiv grid + boundary masking
    # (no output padding, no [:N, :N] slice).
    n2, d2 = 200, 16
    x2 = jax.random.normal(k2, (n2, d2), dtype=jnp.float32)
    out2 = jax.block_until_ready(inner_product_decoder(x2))
    ref2 = jax.nn.sigmoid(x2 @ x2.T)
    assert out2.shape == (n2, n2)
    assert jnp.allclose(out2, ref2, atol=1e-4, rtol=1e-4)

    # Case 3: recommended bf16 output (halves the write-bound HBM traffic).
    out3 = jax.block_until_ready(inner_product_decoder(x1, out_dtype=jnp.bfloat16))
    assert out3.dtype == jnp.bfloat16
    assert jnp.allclose(out3.astype(jnp.float32), ref1, atol=1e-2, rtol=1e-2)

    print("KERNEL_OK")
</pallas_src>

<mosaic_0001>
module attributes {stable_mosaic.version = 11 : i64} {
  func.func @_ipd_kernel_resident(%arg0: i32, %arg1: i32, %arg2: memref<128x32xf32, #tpu.memory_space<vmem>>, %arg3: memref<32x256xf32, #tpu.memory_space<vmem>>, %arg4: memref<128x256xf32, #tpu.memory_space<vmem>>) attributes {dimension_semantics = [#tpu.dimension_semantics<parallel>, #tpu.dimension_semantics<parallel>], iteration_bounds = array<i64: 2, 1>, scalar_prefetch = 0 : i64, scratch_operands = 0 : i64, tpu.core_type = #tpu.core_type<tc>, window_params = [{transform_indices = @transform_0, window_bounds = array<i64: 128, 32>}, {pipeline_mode = #tpu.pipeline_mode<synchronous>, transform_indices = @transform_1, window_bounds = array<i64: 32, 256>}, {transform_indices = @transform_2, window_bounds = array<i64: 128, 256>}]} {
    %c256_i32 = arith.constant 256 : i32
    %0 = arith.muli %arg1, %c256_i32 : i32
    %1 = tpu.assume_multiple %0, 256 : i32
    %c0 = arith.constant 0 : index
    %2 = arith.index_cast %1 : i32 to index
    %3 = vector.load %arg3[%c0, %2] : memref<32x256xf32, #tpu.memory_space<vmem>>, vector<32x256xf32>
    %c0_0 = arith.constant 0 : index
    %c0_1 = arith.constant 0 : index
    %4 = vector.load %arg2[%c0_0, %c0_1] : memref<128x32xf32, #tpu.memory_space<vmem>>, vector<128x32xf32>
    %cst = arith.constant dense<0.000000e+00> : vector<128x256xf32>
    %5 = tpu.matmul %4, %3, %cst {dimension_numbers = #tpu.dot_dimension_numbers<[1], [0], [0], [1], [0, 0, 1, 1], [], []>} : vector<128x32xf32>, vector<32x256xf32>, vector<128x256xf32> -> vector<128x256xf32>
    %cst_2 = arith.constant 5.000000e-01 : f32
    %6 = vector.broadcast %cst_2 : f32 to vector<128x256xf32>
    %7 = arith.mulf %6, %5 : vector<128x256xf32>
    %8 = math.tanh %7 : vector<128x256xf32>
    %cst_3 = arith.constant 5.000000e-01 : f32
    %9 = vector.broadcast %cst_3 : f32 to vector<128x256xf32>
    %10 = arith.mulf %9, %8 : vector<128x256xf32>
    %cst_4 = arith.constant 5.000000e-01 : f32
    %11 = vector.broadcast %cst_4 : f32 to vector<128x256xf32>
    %12 = arith.addf %10, %11 : vector<128x256xf32>
    %c0_5 = arith.constant 0 : index
    %c0_6 = arith.constant 0 : index
    %13 = vector.load %arg4[%c0_5, %c0_6] : memref<128x256xf32, #tpu.memory_space<vmem>>, vector<128x256xf32>
    tpu.vector_store %arg4[%c0_5, %c0_6], %12 {strides = array<i32>} : memref<128x256xf32, #tpu.memory_space<vmem>>, vector<128x256xf32>,
    return
  }
  func.func @transform_0(%arg0: i32, %arg1: i32) -> (i32, i32) {
    %c0_i32 = arith.constant 0 : i32
    %c0_i32_0 = arith.constant 0 : i32
    return %arg0, %c0_i32 : i32, i32
  }
  func.func @transform_1(%arg0: i32, %arg1: i32) -> (i32, i32) {
    %c0_i32 = arith.constant 0 : i32
    %c0_i32_0 = arith.constant 0 : i32
    %c0_i32_1 = arith.constant 0 : i32
    return %c0_i32, %c0_i32_0 : i32, i32
  }
  func.func @transform_2(%arg0: i32, %arg1: i32) -> (i32, i32) {
    %c0_i32 = arith.constant 0 : i32
    return %arg0, %arg1 : i32, i32
  }
}

</mosaic_0001>

<bundles_post_ra>
// kernel: tpu_custom_call.1
= control target key start
LH: loop header
LB: loop body
LE: loop exit
PB: predicated region body
PF: predicated region fallthrough
CT: control target
= control target key end

     0   :  { %7 = vsyncpa [#allocation3], 0  ;;  %s1105_s0 = inlined_call_operand.vmem [shape: f32[256,32], index: 0, kind: input, shape index: {}]   ;;  %s1106_s1 = inlined_call_operand.vmem [shape: f32[32,256], index: 1, kind: input, shape index: {}]   ;;  %s1107_s2 = inlined_call_operand.hbm [shape: f32[256,256], index: 2, kind: output, shape index: {}]  }
   0x1   :  { %9 = vsyncpa [#allocation3 + $0x1], 0  ;;  %s896_s9 = smov 0   ;;  %s898_s10 = smov 0  }
   0x2   :  { %s900_s11 = smov 0   ;;  %s902_s12 = smov 0  }
   0x3   :  { %s904_s13 = smov 0   ;;  %s906_s14 = smov 0  }
   0x4 LB: > { %s622_s15 = sadd.s32 4294967295, %s877_s14   ;;  %s623_s16 = sadd.s32 4294967294, %s877_s14   ;;  %s877_s14 = sphi %s906_s14, %s15_s14   ;;  %s873_s13 = sphi %s904_s13, %s1114_s13   ;;  %s869_s12 = sphi %s902_s12, %s1113_s12   ;;  %s865_s11 = sphi %s900_s11, %s1112_s11   ;;  %s861_s10 = sphi %s898_s10, %s1111_s10   ;;  %s857_s9 = sphi %s896_s9, %s1110_s9  }
   0x5   : > { %s27_s17 = sadd.s32 1, %s873_s13  ;;  %s83_s18 = sadd.s32 1, %s865_s11 }
   0x6   : > { %p29_p0 = scmp.ge.s32.totalorder %s27_s17, 2  ;;  %p93_p1 = scmp.ne.s32.totalorder %s865_s11, %s861_s10 }
   0x7   : > { %p94_p2 = scmp.eq.s32.totalorder %s622_s15, 1  ;;  %p99_p3 = scmp.ne.s32.totalorder %s861_s10, %s857_s9 }
   0x8   : > { %s1116_s17 = smov (%p29_p0, %s27_s17), 0  ;;  %p100_p5 = scmp.eq.s32.totalorder %s623_s16, 1 }
   0x9   : > { %p936_p4 = por %p94_p2, %p93_p1  ;;  %s78_s20 = ssub.s32 %s873_s13, %s1116_s17 }
   0xa   : > { %p626_p6 = scmp.ge.s32.totalorder %s877_s14, 1  ;;  %p81_p7 = scmp.eq.s32.totalorder %s78_s20, 0 }
   0xb   : > { %p943_p8 = por %p100_p5, %p99_p3  ;;  %p130_p9 = scmp.lt.s32.totalorder %s877_s14, 3 }
   0xc   : > { %s949_s22 = scalar_select %p81_p7, %s865_s11, %s83_s18  }
   0xd   : > { %p131_p10 = pnand %p626_p6, %p130_p9 }
   0xe   : > { %s628_s29 = sshll.u32 (!%p131_p10), %s869_s12, 4  ;;  %s149_s26 = sand.u32 (!%p131_p10), 1, %s861_s10  }
   0xf   : > { %134 = sbr.rel (%p131_p10) target bundleno = 234 (0xea), region = 28  ;;  %p153_p11 = scmp.lt.s32.totalorder (!%p131_p10), %s628_s29, 31 }
  0x10   : > { %s627_s27 = sshll.u32 (!%p131_p10), %s149_s26, 8  ;;  %s529_s6 = scalar_lea.sflag (!%p131_p10), [#allocation3], %s149_s26 }
  0x11   : > { %s1032_s28 = scalar_lea.vmem (!%p131_p10), [#allocation2], %s627_s27  ;;  %s819_s18 = scalar_lea.hbm (!%p131_p10), %s1107_s2, 512 }
  0x14   : > { %v171_v0 = vld [vmem:[%s1106_s1 + $0x30] sm:$0xff]  ;;  %v172_v1 = vld [vmem:[%s1106_s1 + $0x38] sm:$0xff]  ;;  %v169_v2 = vld [vmem:[%s1106_s1 + $0x20] sm:$0xff]  ;;  %s1118_s29 = smov (!%p153_p11, %s628_s29), 31  ;;  %vm189_vm0 = vcmask 261120  }
  0x15   : > { %670 = vmatpush.msra.mxu2 %v171_v0  ;;  %674 = vmatpush.msra.mxu3 %v172_v1  ;;  %v170_v3 = vld [vmem:[%s1106_s1 + $0x28] sm:$0xff]  ;;  %v167_v4 = vld [vmem:[%s1106_s1 + $0x10] sm:$0xff]  ;;  %v168_v5 = vld [vmem:[%s1106_s1 + $0x18] sm:$0xff]  ;;  %s629_s20 = sshll.u32 %s1118_s29, 3  ;;  %s669_s29 = sshll.u32 %s869_s12, 8 }
  0x16   : > { %250 = vmatpush.msra.mxu0 %v171_v0  ;;  %315 = vmatpush.msra.mxu1 %v172_v1  ;;  %v165_v6 = vld [vmem:[%s1106_s1] sm:$0xff]  ;;  %v166_v7 = vld [vmem:[%s1106_s1 + $0x8] sm:$0xff]  ;;  %s979_s25 = scalar_lea.vmem %s1105_s0, %s629_s20  ;;  %s543_s4 = scalar_lea.hbm %s1107_s2, %s669_s29 }
  0x17   : > { %671 = vmatpush.msra.mxu2 %v169_v2  ;;  %675 = vmatpush.msra.mxu3 %v170_v3  ;;  %v181_v8 = vld [vmem:[%s979_s25 + $0x40] sm:$0xff]  ;;  %v182_v10 = vld [vmem:[%s979_s25 + $0x48] sm:$0xff]  ;;  %v183_v12 = vld [vmem:[%s979_s25 + $0x50] sm:$0xff]  ;;  %s544_s12 = sshll.u32 %s1032_s28, 4  ;;  %s546_s5 = sshll.u32 %s543_s4, 4  ;;  %s545_s12 = int_to_ptr.vmem [resolvable:$true] %s544_s12  ;;  %s547_s5 = int_to_ptr.hbm [resolvable:$true] %s546_s5 }
  0x18   : > { %251 = vmatpush.msra.mxu0 %v169_v2  ;;  %316 = vmatpush.msra.mxu1 %v170_v3  ;;  %v173_v9 = vld [vmem:[%s979_s25] sm:$0xff]  ;;  %v174_v11 = vld [vmem:[%s979_s25 + $0x8] sm:$0xff]  ;;  %v175_v13 = vld [vmem:[%s979_s25 + $0x10] sm:$0xff]  ;;  %s813_s7 = sshra.s32 %s547_s5, 4  ;;  %s814_s7 = int_to_ptr.hbm [resolvable:$true] %s813_s7 }
  0x19   : > { %672 = vmatpush.msra.mxu2 %v167_v4  ;;  %676 = vmatpush.msra.mxu3 %v168_v5  ;;  %v184_v14 = vld [vmem:[%s979_s25 + $0x58] sm:$0xff]  ;;  %v185_v16 = vld [vmem:[%s979_s25 + $0x60] sm:$0xff]  ;;  %v186_v18 = vld [vmem:[%s979_s25 + $0x68] sm:$0xff]  ;;  %s815_s8 = scalar_lea.hbm %s814_s7, 256  ;;  %p820_p1 = scmp.lt.s32.totalorder %s814_s7, %s1107_s2 }
  0x1a   : > { %252 = vmatpush.msra.mxu0 %v167_v4  ;;  %317 = vmatpush.msra.mxu1 %v168_v5  ;;  %v176_v15 = vld [vmem:[%s979_s25 + $0x18] sm:$0xff]  ;;  %v177_v17 = vld [vmem:[%s979_s25 + $0x20] sm:$0xff]  ;;  %v178_v19 = vld [vmem:[%s979_s25 + $0x28] sm:$0xff]  ;;  %p816_p12 = scmp.ne.s32.totalorder %s814_s7, %s815_s8  ;;  %p821_p2 = scmp.lt.s32.totalorder %s819_s18, %s815_s8 }
  0x1b   : > { %673 = vmatpush.msra.mxu2 %v165_v6  ;;  %677 = vmatpush.msra.mxu3 %v166_v7  ;;  %v187_v20 = vld [vmem:[%s979_s25 + $0x70] sm:$0xff]  ;;  %v188_v22 = vld [vmem:[%s979_s25 + $0x78] sm:$0xff] }
  0x1c   : > { %638 = vmatmul.msk.f32.vlgmr.msra.gmra.mxu2 %vm189_vm0, %v181_v8  ;;  %654 = vmatmul.msk.f32.vlgmr.msra.gmra.mxu3 %vm189_vm0, %v181_v8  ;;  %v179_v21 = vld [vmem:[%s979_s25 + $0x30] sm:$0xff]  ;;  %v180_v23 = vld [vmem:[%s979_s25 + $0x38] sm:$0xff]  ;;  %p817_p13 = pnand %p816_p12, %p936_p4  ;;  %p822_p3 = por %p821_p2, %p820_p1 }
  0x1d   : > { %253 = vmatpush.msra.mxu0 %v165_v6  ;;  %318 = vmatpush.msra.mxu1 %v166_v7 }
  0x1e   : > { %630 = vmatmul.msk.f32.vlgmr.msra.gmra.mxu0 %vm189_vm0, %v173_v9  ;;  %646 = vmatmul.msk.f32.vlgmr.msra.gmra.mxu1 %vm189_vm0, %v173_v9  ;;  %p818_p0 = pneg %p817_p13 }
  0x20   : > { %p823_p5 = pnand %p822_p3, %p818_p0 }
  0x24   : > { %639 = vmatmul.msk.f32.gmra.mxu2 %vm189_vm0, %v182_v10  ;;  %655 = vmatmul.msk.f32.gmra.mxu3 %vm189_vm0, %v182_v10 }
  0x26   : > { %631 = vmatmul.msk.f32.gmra.mxu0 %vm189_vm0, %v174_v11  ;;  %647 = vmatmul.msk.f32.gmra.mxu1 %vm189_vm0, %v174_v11 }
  0x2c   : > { %640 = vmatmul.msk.f32.gmra.mxu2 %vm189_vm0, %v183_v12  ;;  %656 = vmatmul.msk.f32.gmra.mxu3 %vm189_vm0, %v183_v12 }
  0x2e   : > { %632 = vmatmul.msk.f32.gmra.mxu0 %vm189_vm0, %v175_v13  ;;  %648 = vmatmul.msk.f32.gmra.mxu1 %vm189_vm0, %v175_v13 }
  0x34   : > { %641 = vmatmul.msk.f32.gmra.mxu2 %vm189_vm0, %v184_v14  ;;  %657 = vmatmul.msk.f32.gmra.mxu3 %vm189_vm0, %v184_v14 }
  0x36   : > { %633 = vmatmul.msk.f32.gmra.mxu0 %vm189_vm0, %v176_v15  ;;  %649 = vmatmul.msk.f32.gmra.mxu1 %vm189_vm0, %v176_v15 }
  0x3c   : > { %642 = vmatmul.msk.f32.gmra.mxu2 %vm189_vm0, %v185_v16  ;;  %658 = vmatmul.msk.f32.gmra.mxu3 %vm189_vm0, %v185_v16 }
  0x3e   : > { %634 = vmatmul.msk.f32.gmra.mxu0 %vm189_vm0, %v177_v17  ;;  %650 = vmatmul.msk.f32.gmra.mxu1 %vm189_vm0, %v177_v17 }
  0x44   : > { %643 = vmatmul.msk.f32.gmra.mxu2 %vm189_vm0, %v186_v18  ;;  %659 = vmatmul.msk.f32.gmra.mxu3 %vm189_vm0, %v186_v18 }
  0x46   : > { %635 = vmatmul.msk.f32.gmra.mxu0 %vm189_vm0, %v178_v19  ;;  %651 = vmatmul.msk.f32.gmra.mxu1 %vm189_vm0, %v178_v19 }
  0x4c   : > { %644 = vmatmul.msk.f32.gmra.mxu2 %vm189_vm0, %v187_v20  ;;  %660 = vmatmul.msk.f32.gmra.mxu3 %vm189_vm0, %v187_v20 }
  0x4e   : > { %636 = vmatmul.msk.f32.gmra.mxu0 %vm189_vm0, %v179_v21  ;;  %652 = vmatmul.msk.f32.gmra.mxu1 %vm189_vm0, %v179_v21 }
  0x54   : > { %645 = vmatmul.msk.f32.gmra.mxu2 %vm189_vm0, %v188_v22  ;;  %661 = vmatmul.msk.f32.gmra.mxu3 %vm189_vm0, %v188_v22 }
  0x56   : > { %637 = vmatmul.msk.f32.gmra.mxu0 %vm189_vm0, %v180_v23  ;;  %653 = vmatmul.msk.f32.gmra.mxu1 %vm189_vm0, %v180_v23 }
  0x9b   : > { %v255_v24 = vpop.f32.mrf.mxu0  ;;  %v320_v25 = vpop.f32.mrf.mxu1 }
  0x9c   : > { %v368_v26 = vmul.f32 0.5, %v255_v24  ;;  %v369_v27 = vmul.f32 0.5, %v320_v25 }
  0x9e   : > { %735 = vtanh.f32 %v368_v26 }
  0x9f   : > { %v279_v28 = vpop.f32.mrf.mxu2  ;;  %737 = vtanh.f32 %v369_v27  ;;  %v344_v29 = vpop.f32.mrf.mxu3 }
  0xa0   : > { %v384_v30 = vmul.f32 0.5, %v279_v28  ;;  %v385_v31 = vmul.f32 0.5, %v344_v29 }
  0xa2   : > { %739 = vtanh.f32 %v384_v30 }
  0xa3   : > { %741 = vtanh.f32 %v385_v31  ;;  %v258_v32 = vpop.f32.mrf.mxu0  ;;  %v323_v33 = vpop.f32.mrf.mxu1 }
  0xa4   : > { %v736_v34 = vpop.eup %735  ;;  %v370_v35 = vmul.f32 0.5, %v258_v32  ;;  %v371_v36 = vmul.f32 0.5, %v323_v33 }
  0xa5   : > { %v738_v37 = vpop.eup %737  ;;  %v432_v38 = vmul.f32 0.5, %v736_v34 }
  0xa6   : > { %v433_v39 = vmul.f32 0.5, %v738_v37  ;;  %743 = vtanh.f32 %v370_v35 }
  0xa7   : > { %v464_v40 = vadd.f32 0.5, %v432_v38  ;;  %v282_v41 = vpop.f32.mrf.mxu2  ;;  %745 = vtanh.f32 %v371_v36  ;;  %v347_v42 = vpop.f32.mrf.mxu3 }
  0xa8   : > { %v740_v43 = vpop.eup %739  ;;  %v465_v44 = vadd.f32 0.5, %v433_v39  ;;  %v386_v45 = vmul.f32 0.5, %v282_v41  ;;  %v387_v46 = vmul.f32 0.5, %v347_v42 }
  0xa9   : > { %v742_v47 = vpop.eup %741  ;;  %496 = vst [vmem:[%s1032_s28] sm:$0xff] %v464_v40  ;;  %v448_v48 = vmul.f32 0.5, %v740_v43 }
  0xaa   : > { %497 = vst [vmem:[%s1032_s28 + $0x8] sm:$0xff] %v465_v44  ;;  %v449_v49 = vmul.f32 0.5, %v742_v47  ;;  %747 = vtanh.f32 %v386_v45 }
  0xab   : > { %v480_v50 = vadd.f32 0.5, %v448_v48  ;;  %749 = vtanh.f32 %v387_v46  ;;  %v261_v51 = vpop.f32.mrf.mxu0  ;;  %v326_v52 = vpop.f32.mrf.mxu1 }
  0xac   : > { %v744_v53 = vpop.eup %743  ;;  %v481_v54 = vadd.f32 0.5, %v449_v49  ;;  %v372_v55 = vmul.f32 0.5, %v261_v51  ;;  %v373_v56 = vmul.f32 0.5, %v326_v52 }
  0xad   : > { %v746_v57 = vpop.eup %745  ;;  %512 = vst [vmem:[%s1032_s28 + $0x80] sm:$0xff] %v480_v50  ;;  %v434_v58 = vmul.f32 0.5, %v744_v53 }
  0xae   : > { %513 = vst [vmem:[%s1032_s28 + $0x88] sm:$0xff] %v481_v54  ;;  %v435_v59 = vmul.f32 0.5, %v746_v57  ;;  %751 = vtanh.f32 %v372_v55 }
  0xaf   : > { %v466_v60 = vadd.f32 0.5, %v434_v58  ;;  %v285_v61 = vpop.f32.mrf.mxu2  ;;  %753 = vtanh.f32 %v373_v56  ;;  %v350_v62 = vpop.f32.mrf.mxu3 }
  0xb0   : > { %v748_v63 = vpop.eup %747  ;;  %v467_v0 = vadd.f32 0.5, %v435_v59  ;;  %v388_v1 = vmul.f32 0.5, %v285_v61  ;;  %v389_v2 = vmul.f32 0.5, %v350_v62 }
  0xb1   : > { %v750_v3 = vpop.eup %749  ;;  %498 = vst [vmem:[%s1032_s28 + $0x10] sm:$0xff] %v466_v60  ;;  %v450_v4 = vmul.f32 0.5, %v748_v63 }
  0xb2   : > { %499 = vst [vmem:[%s1032_s28 + $0x18] sm:$0xff] %v467_v0  ;;  %v451_v5 = vmul.f32 0.5, %v750_v3  ;;  %755 = vtanh.f32 %v388_v1 }
  0xb3   : > { %v482_v6 = vadd.f32 0.5, %v450_v4  ;;  %757 = vtanh.f32 %v389_v2  ;;  %v264_v7 = vpop.f32.mrf.mxu0  ;;  %v329_v8 = vpop.f32.mrf.mxu1 }
  0xb4   : > { %v752_v9 = vpop.eup %751  ;;  %v483_v10 = vadd.f32 0.5, %v451_v5  ;;  %v374_v11 = vmul.f32 0.5, %v264_v7  ;;  %v375_v12 = vmul.f32 0.5, %v329_v8 }
  0xb5   : > { %v754_v13 = vpop.eup %753  ;;  %514 = vst [vmem:[%s1032_s28 + $0x90] sm:$0xff] %v482_v6  ;;  %v436_v14 = vmul.f32 0.5, %v752_v9 }
  0xb6   : > { %515 = vst [vmem:[%s1032_s28 + $0x98] sm:$0xff] %v483_v10  ;;  %v437_v15 = vmul.f32 0.5, %v754_v13  ;;  %759 = vtanh.f32 %v374_v11 }
  0xb7   : > { %v468_v16 = vadd.f32 0.5, %v436_v14  ;;  %v288_v17 = vpop.f32.mrf.mxu2  ;;  %761 = vtanh.f32 %v375_v12  ;;  %v353_v18 = vpop.f32.mrf.mxu3 }
  0xb8   : > { %v756_v19 = vpop.eup %755  ;;  %v469_v20 = vadd.f32 0.5, %v437_v15  ;;  %v390_v21 = vmul.f32 0.5, %v288_v17  ;;  %v391_v22 = vmul.f32 0.5, %v353_v18 }
  0xb9   : > { %v758_v23 = vpop.eup %757  ;;  %500 = vst [vmem:[%s1032_s28 + $0x20] sm:$0xff] %v468_v16  ;;  %v452_v24 = vmul.f32 0.5, %v756_v19 }
  0xba   : > { %501 = vst [vmem:[%s1032_s28 + $0x28] sm:$0xff] %v469_v20  ;;  %v453_v25 = vmul.f32 0.5, %v758_v23  ;;  %763 = vtanh.f32 %v390_v21 }
  0xbb   : > { %v484_v26 = vadd.f32 0.5, %v452_v24  ;;  %765 = vtanh.f32 %v391_v22  ;;  %v267_v27 = vpop.f32.mrf.mxu0  ;;  %v332_v28 = vpop.f32.mrf.mxu1 }
  0xbc   : > { %v760_v29 = vpop.eup %759  ;;  %v485_v30 = vadd.f32 0.5, %v453_v25  ;;  %v376_v31 = vmul.f32 0.5, %v267_v27  ;;  %v377_v32 = vmul.f32 0.5, %v332_v28 }
  0xbd   : > { %v762_v33 = vpop.eup %761  ;;  %516 = vst [vmem:[%s1032_s28 + $0xa0] sm:$0xff] %v484_v26  ;;  %v438_v34 = vmul.f32 0.5, %v760_v29 }
  0xbe   : > { %517 = vst [vmem:[%s1032_s28 + $0xa8] sm:$0xff] %v485_v30  ;;  %v439_v35 = vmul.f32 0.5, %v762_v33  ;;  %767 = vtanh.f32 %v376_v31 }
  0xbf   : > { %v470_v36 = vadd.f32 0.5, %v438_v34  ;;  %v291_v37 = vpop.f32.mrf.mxu2  ;;  %769 = vtanh.f32 %v377_v32  ;;  %v356_v38 = vpop.f32.mrf.mxu3 }
  0xc0   : > { %v764_v39 = vpop.eup %763  ;;  %v471_v40 = vadd.f32 0.5, %v439_v35  ;;  %v392_v41 = vmul.f32 0.5, %v291_v37  ;;  %v393_v42 = vmul.f32 0.5, %v356_v38 }
  0xc1   : > { %v766_v43 = vpop.eup %765  ;;  %502 = vst [vmem:[%s1032_s28 + $0x30] sm:$0xff] %v470_v36  ;;  %v454_v44 = vmul.f32 0.5, %v764_v39 }
  0xc2   : > { %503 = vst [vmem:[%s1032_s28 + $0x38] sm:$0xff] %v471_v40  ;;  %v455_v45 = vmul.f32 0.5, %v766_v43  ;;  %771 = vtanh.f32 %v392_v41 }
  0xc3   : > { %v486_v46 = vadd.f32 0.5, %v454_v44  ;;  %773 = vtanh.f32 %v393_v42  ;;  %v270_v47 = vpop.f32.mrf.mxu0  ;;  %v335_v48 = vpop.f32.mrf.mxu1 }
  0xc4   : > { %v768_v49 = vpop.eup %767  ;;  %v487_v50 = vadd.f32 0.5, %v455_v45  ;;  %v378_v51 = vmul.f32 0.5, %v270_v47  ;;  %v379_v52 = vmul.f32 0.5, %v335_v48 }
  0xc5   : > { %v770_v53 = vpop.eup %769  ;;  %518 = vst [vmem:[%s1032_s28 + $0xb0] sm:$0xff] %v486_v46  ;;  %v440_v54 = vmul.f32 0.5, %v768_v49 }
  0xc6   : > { %519 = vst [vmem:[%s1032_s28 + $0xb8] sm:$0xff] %v487_v50  ;;  %v441_v55 = vmul.f32 0.5, %v770_v53  ;;  %775 = vtanh.f32 %v378_v51 }
  0xc7   : > { %v472_v56 = vadd.f32 0.5, %v440_v54  ;;  %v294_v57 = vpop.f32.mrf.mxu2  ;;  %777 = vtanh.f32 %v379_v52  ;;  %v359_v58 = vpop.f32.mrf.mxu3 }
  0xc8   : > { %v772_v59 = vpop.eup %771  ;;  %v473_v60 = vadd.f32 0.5, %v441_v55  ;;  %v394_v61 = vmul.f32 0.5, %v294_v57  ;;  %v395_v62 = vmul.f32 0.5, %v359_v58 }
  0xc9   : > { %v774_v63 = vpop.eup %773  ;;  %504 = vst [vmem:[%s1032_s28 + $0x40] sm:$0xff] %v472_v56  ;;  %v456_v0 = vmul.f32 0.5, %v772_v59 }
  0xca   : > { %505 = vst [vmem:[%s1032_s28 + $0x48] sm:$0xff] %v473_v60  ;;  %v457_v1 = vmul.f32 0.5, %v774_v63  ;;  %779 = vtanh.f32 %v394_v61 }
  0xcb   : > { %v488_v2 = vadd.f32 0.5, %v456_v0  ;;  %781 = vtanh.f32 %v395_v62  ;;  %v273_v3 = vpop.f32.mrf.mxu0  ;;  %v338_v4 = vpop.f32.mrf.mxu1 }
  0xcc   : > { %v776_v5 = vpop.eup %775  ;;  %v489_v6 = vadd.f32 0.5, %v457_v1  ;;  %v380_v7 = vmul.f32 0.5, %v273_v3  ;;  %v381_v8 = vmul.f32 0.5, %v338_v4 }
  0xcd   : > { %v778_v9 = vpop.eup %777  ;;  %520 = vst [vmem:[%s1032_s28 + $0xc0] sm:$0xff] %v488_v2  ;;  %v442_v10 = vmul.f32 0.5, %v776_v5 }
  0xce   : > { %521 = vst [vmem:[%s1032_s28 + $0xc8] sm:$0xff] %v489_v6  ;;  %v443_v11 = vmul.f32 0.5, %v778_v9  ;;  %783 = vtanh.f32 %v380_v7 }
  0xcf   : > { %v474_v12 = vadd.f32 0.5, %v442_v10  ;;  %v297_v13 = vpop.f32.mrf.mxu2  ;;  %785 = vtanh.f32 %v381_v8  ;;  %v362_v14 = vpop.f32.mrf.mxu3 }
  0xd0   : > { %v780_v15 = vpop.eup %779  ;;  %v475_v16 = vadd.f32 0.5, %v443_v11  ;;  %v396_v17 = vmul.f32 0.5, %v297_v13  ;;  %v397_v18 = vmul.f32 0.5, %v362_v14 }
  0xd1   : > { %v782_v19 = vpop.eup %781  ;;  %506 = vst [vmem:[%s1032_s28 + $0x50] sm:$0xff] %v474_v12  ;;  %v458_v20 = vmul.f32 0.5, %v780_v15 }
  0xd2   : > { %507 = vst [vmem:[%s1032_s28 + $0x58] sm:$0xff] %v475_v16  ;;  %v459_v21 = vmul.f32 0.5, %v782_v19  ;;  %787 = vtanh.f32 %v396_v17 }
  0xd3   : > { %v490_v22 = vadd.f32 0.5, %v458_v20  ;;  %789 = vtanh.f32 %v397_v18  ;;  %v276_v23 = vpop.f32.mrf.mxu0  ;;  %v341_v24 = vpop.f32.mrf.mxu1 }
  0xd4   : > { %v784_v25 = vpop.eup %783  ;;  %v491_v26 = vadd.f32 0.5, %v459_v21  ;;  %v382_v27 = vmul.f32 0.5, %v276_v23  ;;  %v383_v28 = vmul.f32 0.5, %v341_v24 }
  0xd5   : > { %v786_v29 = vpop.eup %785  ;;  %522 = vst [vmem:[%s1032_s28 + $0xd0] sm:$0xff] %v490_v22  ;;  %v444_v30 = vmul.f32 0.5, %v784_v25 }
  0xd6   : > { %523 = vst [vmem:[%s1032_s28 + $0xd8] sm:$0xff] %v491_v26  ;;  %v445_v31 = vmul.f32 0.5, %v786_v29  ;;  %791 = vtanh.f32 %v382_v27 }
  0xd7   : > { %v476_v32 = vadd.f32 0.5, %v444_v30  ;;  %v300_v33 = vpop.f32.mrf.mxu2  ;;  %793 = vtanh.f32 %v383_v28  ;;  %v365_v34 = vpop.f32.mrf.mxu3 }
  0xd8   : > { %v788_v35 = vpop.eup %787  ;;  %v477_v36 = vadd.f32 0.5, %v445_v31  ;;  %v398_v37 = vmul.f32 0.5, %v300_v33  ;;  %v399_v38 = vmul.f32 0.5, %v365_v34 }
  0xd9   : > { %v790_v39 = vpop.eup %789  ;;  %508 = vst [vmem:[%s1032_s28 + $0x60] sm:$0xff] %v476_v32  ;;  %v460_v40 = vmul.f32 0.5, %v788_v35 }
  0xda   : > { %509 = vst [vmem:[%s1032_s28 + $0x68] sm:$0xff] %v477_v36  ;;  %v461_v41 = vmul.f32 0.5, %v790_v39  ;;  %795 = vtanh.f32 %v398_v37 }
  0xdb   : > { %v492_v42 = vadd.f32 0.5, %v460_v40  ;;  %797 = vtanh.f32 %v399_v38 }
  0xdc   : > { %v792_v43 = vpop.eup %791  ;;  %v493_v44 = vadd.f32 0.5, %v461_v41 }
  0xdd   : > { %v794_v45 = vpop.eup %793  ;;  %524 = vst [vmem:[%s1032_s28 + $0xe0] sm:$0xff] %v492_v42  ;;  %v446_v46 = vmul.f32 0.5, %v792_v43 }
  0xde   : > { %525 = vst [vmem:[%s1032_s28 + $0xe8] sm:$0xff] %v493_v44  ;;  %v447_v47 = vmul.f32 0.5, %v794_v45 }
  0xdf   : > { %v478_v48 = vadd.f32 0.5, %v446_v46 }
  0xe0   : > { %v796_v49 = vpop.eup %795  ;;  %v479_v50 = vadd.f32 0.5, %v447_v47 }
  0xe1   : > { %v798_v51 = vpop.eup %797  ;;  %510 = vst [vmem:[%s1032_s28 + $0x70] sm:$0xff] %v478_v48  ;;  %v462_v52 = vmul.f32 0.5, %v796_v49 }
  0xe2   : > { %511 = vst [vmem:[%s1032_s28 + $0x78] sm:$0xff] %v479_v50  ;;  %v463_v53 = vmul.f32 0.5, %v798_v51 }
  0xe3   : > { %v494_v54 = vadd.f32 0.5, %v462_v52 }
  0xe4   : > { %v495_v55 = vadd.f32 0.5, %v463_v53 }
  0xe5   : > { %526 = vst [vmem:[%s1032_s28 + $0xf0] sm:$0xff] %v494_v54 }
  0xe6   : > { %527 = vst [vmem:[%s1032_s28 + $0xf8] sm:$0xff] %v495_v55 }
  0xe7   : > { %826 = shalt.err (!%p823_p5)
}
  0xe8   : > { %s879_s24 = smov 256   ;;  %s880_s25 = smov 16  }
  0xe9   : > { %678 = dma.vmem_to_hbm [thread:$0]  (%p936_p4), %s545_s12, 4096, %s547_s5, %s529_s6, %s879_s24, %s879_s24, %s880_s25  }
  0xea PF: > { %p684_p6 = scmp.ge.s32.totalorder %s877_s14, 2  ;;  %s561_s26 = sand.u32 1, %s857_s9  }
  0xeb   : > { %s562_s27 = scalar_lea.sflag [#allocation3], %s561_s26 }
  0xec   : > { %p681_p7 = pnand %p684_p6, %p943_p8 }
  0xee   : > { %p682_p9 = pneg %p681_p7 }
  0xf0   : > { %852 = dma.done.wait (%p682_p9), %s562_s27, 4096  }
  0xf1   : > { %854 = vsyncadd (%p682_p9), %s562_s27, 4294963200  ;;  %s15_s14 = sadd.s32 1, %s877_s14   ;;  %s1110_s9 = smov %s861_s10 }
  0xf2   : > { %p12_p10 = scmp.ge.s32.totalorder %s15_s14, 4   ;;  %s1111_s10 = smov %s865_s11 }
  0xf3   : > { %s1112_s11 = smov %s949_s22  ;;  %s1113_s12 = smov %s873_s13 }
  0xf4   : > { %s1114_s13 = smov %s1116_s17  ;;  %14 = sbr.rel (!%p12_p10) target bundleno = 4 (0x4), region = 64 }
  0xf9   :  { %568 = vsyncpa [#allocation3], 1 }
  0xfa   :  { %570 = vsyncpa [#allocation3 + $0x1], 1 }

</bundles_post_ra>
